<compile_context>
chip_gen: v6e
topology: v6e:2x2x1
jax: 0.10.0
libtpu: 0.0.40
codegen_flags: <defaults>
</compile_context>

<pallas_src>
import functools

import jax
import jax.numpy as jnp
from jax.experimental import pallas as pl
from jax.experimental.pallas import tpu as pltpu


def _elu_plus_one(x):
    # elu(x) + 1 == x + 1 for x > 0, exp(x) for x <= 0   (alpha = 1.0, exact)
    return jnp.where(x > 0, x + 1.0, jnp.exp(x))


def _vmem_limit_bytes():
    try:
        cap = pltpu.get_tpu_info().vmem_capacity_bytes
    except Exception:
        cap = 64 * 1024 * 1024
    # Leave headroom for compiler-internal scratch; ~96-100 MiB on 128 MiB parts
    # (v5e/v6e), ~48 MiB on v7x (64 MiB physical).
    return min(int(cap * 3 // 4), 100 * 1024 * 1024)


# --------------------- kernel 1: per-batch KV / K-sum reduction ---------------------

def _kv_reduce_body(hm_ref, k_ref, v_ref, kvm_ref, kv_out, msum_out, *, mxu_dtype):
    kf = _elu_plus_one(k_ref[0].astype(jnp.float32))            # [S, HD]
    if kvm_ref is not None:
        # Masked K rows become zero, so their V contribution to KV vanishes too;
        # the explicit `values * kv_mask` of the PyTorch code is redundant here.
        kf = kf * kvm_ref[0].astype(jnp.float32)
    kf_m = kf.astype(mxu_dtype)
    v_m = v_ref[0].astype(mxu_dtype)                             # [S, HD]

    # Head-batched KV:  KV[r, c] = sum_s Kf[s, r] * V[s, c]      -> [HD, HD]
    kv = jax.lax.dot_general(kf_m, v_m, (((0,), (0,)), ((), ())),
                             preferred_element_type=jnp.float32)
    # K-sum as a column vector via one tall-skinny matmul:        -> [HD, 1]
    ones_col = jnp.ones((kf_m.shape[0], 1), mxu_dtype)
    ksum_col = jax.lax.dot_general(kf_m, ones_col, (((0,), (0,)), ((), ())),
                                   preferred_element_type=jnp.float32)

    hm = hm_ref[...].astype(jnp.float32)                         # [HD, HD] block-diag
    kv_out[0] = (kv * hm).astype(kv_out.dtype)
    # msum[r, c] = ksum[r] if head(r) == head(c) else 0
    #  => Qf @ msum already yields the per-head denominator broadcast to D lanes.
    msum_out[0] = (ksum_col * hm).astype(msum_out.dtype)


def _kv_reduce_nomask(hm_ref, k_ref, v_ref, kv_out, msum_out, *, mxu_dtype):
    _kv_reduce_body(hm_ref, k_ref, v_ref, None, kv_out, msum_out, mxu_dtype=mxu_dtype)


def _kv_reduce_masked(hm_ref, k_ref, v_ref, kvm_ref, kv_out, msum_out, *, mxu_dtype):
    _kv_reduce_body(hm_ref, k_ref, v_ref, kvm_ref, kv_out, msum_out, mxu_dtype=mxu_dtype)


# --------------------------- kernel 2: per-L-tile attention -------------------------

def _attn_body(q_ref, kv_ref, msum_ref, qm_ref, o_ref, *, eps, mxu_dtype):
    qf = _elu_plus_one(q_ref[0].astype(jnp.float32))             # [TL, HD]
    if qm_ref is not None:
        qf = qf * qm_ref[0].astype(jnp.float32)                  # [TL, 1] broadcast
    qf_m = qf.astype(mxu_dtype)

    num = jnp.dot(qf_m, kv_ref[0], preferred_element_type=jnp.float32)    # [TL, HD]
    den = jnp.dot(qf_m, msum_ref[0], preferred_element_type=jnp.float32)  # [TL, HD]
    out = num * pl.reciprocal(den + eps, approx=True)
    o_ref[0] = out.astype(o_ref.dtype)


def _attn_nomask(q_ref, kv_ref, msum_ref, o_ref, *, eps, mxu_dtype):
    _attn_body(q_ref, kv_ref, msum_ref, None, o_ref, eps=eps, mxu_dtype=mxu_dtype)


def _attn_masked(q_ref, kv_ref, msum_ref, qm_ref, o_ref, *, eps, mxu_dtype):
    _attn_body(q_ref, kv_ref, msum_ref, qm_ref, o_ref, eps=eps, mxu_dtype=mxu_dtype)


# ------------------------------------- wrapper --------------------------------------

def linear_attention(queries, keys, values, q_mask=None, kv_mask=None,
                     eps=1e-6, block_l=1024, mxu_dtype=jnp.bfloat16):
    """queries: [N, L, H, D], keys/values: [N, S, H, D], masks: [N, L] / [N, S].
    Returns [N, L, H, D] (matches the PyTorch module forward).

    mxu_dtype=jnp.bfloat16 feeds the MXU bf16 operands with f32 accumulation
    (fastest on all TPU generations); pass jnp.float32 for bit-closer numerics."""
    N, L, H, D = queries.shape
    S = keys.shape[1]
    HD = H * D
    dtype = queries.dtype

    # Free reshapes: [N, L, H, D] is already contiguous as [N, L, H*D].
    q = queries.reshape(N, L, HD)
    k = keys.reshape(N, S, HD)
    v = values.reshape(N, S, HD)

    # Static block-diagonal head mask (tiny constant input; DMA'd once).
    hid = jnp.arange(HD) // D
    head_mask = (hid[:, None] == hid[None, :]).astype(jnp.float32)          # [HD, HD]

    vmem_limit = _vmem_limit_bytes()

    # ---- stage 1: per-batch reduction -> KV, msum in HBM ([N, HD, HD] each) ----
    red_in_specs = [
        pl.BlockSpec((HD, HD), lambda n: (0, 0)),          # head mask (constant)
        pl.BlockSpec((1, S, HD), lambda n: (n, 0, 0)),     # K
        pl.BlockSpec((1, S, HD), lambda n: (n, 0, 0)),     # V
    ]
    red_args = [head_mask, k, v]
    if kv_mask is not None:
        kvm = kv_mask.astype(jnp.float32).reshape(N, S, 1)
        red_in_specs.append(pl.BlockSpec((1, S, 1), lambda n: (n, 0, 0)))
        red_args.append(kvm)
        red_kernel = functools.partial(_kv_reduce_masked, mxu_dtype=mxu_dtype)
    else:
        red_kernel = functools.partial(_kv_reduce_nomask, mxu_dtype=mxu_dtype)

    kv_mat, msum_mat = pl.pallas_call(
        red_kernel,
        out_shape=(jax.ShapeDtypeStruct((N, HD, HD), mxu_dtype),
                   jax.ShapeDtypeStruct((N, HD, HD), mxu_dtype)),
        grid_spec=pltpu.PrefetchScalarGridSpec(
            num_scalar_prefetch=0,
            grid=(N,),
            in_specs=red_in_specs,
            out_specs=(pl.BlockSpec((1, HD, HD), lambda n: (n, 0, 0)),
                       pl.BlockSpec((1, HD, HD), lambda n: (n, 0, 0)))),
        compiler_params=pltpu.CompilerParams(
            dimension_semantics=("parallel",),
            vmem_limit_bytes=vmem_limit),
    )(*red_args)

    # ---- stage 2: per-L-tile attention (both axes parallel; no scratch carry) ----
    TL = L if L <= block_l else block_l
    grid = (N, pl.cdiv(L, TL))

    main_in_specs = [
        pl.BlockSpec((1, TL, HD), lambda n, l: (n, l, 0)),   # Q
        pl.BlockSpec((1, HD, HD), lambda n, l: (n, 0, 0)),   # KV   (constant in l)
        pl.BlockSpec((1, HD, HD), lambda n, l: (n, 0, 0)),   # msum (constant in l)
    ]
    main_args = [q, kv_mat, msum_mat]
    if q_mask is not None:
        qm = q_mask.astype(jnp.float32).reshape(N, L, 1)
        main_in_specs.append(pl.BlockSpec((1, TL, 1), lambda n, l: (n, l, 0)))
        main_args.append(qm)
        main_kernel = functools.partial(_attn_masked, eps=eps, mxu_dtype=mxu_dtype)
    else:
        main_kernel = functools.partial(_attn_nomask, eps=eps, mxu_dtype=mxu_dtype)

    out = pl.pallas_call(
        main_kernel,
        out_shape=jax.ShapeDtypeStruct((N, L, HD), dtype),
        grid_spec=pltpu.PrefetchScalarGridSpec(
            num_scalar_prefetch=0,
            grid=grid,
            in_specs=main_in_specs,
            out_specs=pl.BlockSpec((1, TL, HD), lambda n, l: (n, l, 0))),
        compiler_params=pltpu.CompilerParams(
            dimension_semantics=("parallel", "parallel"),
            vmem_limit_bytes=vmem_limit),
    )(*main_args)

    return out.reshape(N, L, H, D)


# ----------------------------------- reference --------------------------------------

def _reference(queries, keys, values, q_mask=None, kv_mask=None, eps=1e-6):
    """Pure-JAX mirror of the PyTorch forward (for verification)."""
    Q = jax.nn.elu(queries) + 1.0
    K = jax.nn.elu(keys) + 1.0
    if q_mask is not None:
        Q = Q * q_mask.astype(Q.dtype)[:, :, None, None]
    if kv_mask is not None:
        K = K * kv_mask.astype(K.dtype)[:, :, None, None]
        values = values * kv_mask.astype(values.dtype)[:, :, None, None]
    v_length = values.shape[1]
    values = values / v_length
    KV = jnp.einsum('nshd,nshv->nhdv', K, values)
    Z = 1.0 / (jnp.einsum('nlhd,nhd->nlh', Q, K.sum(axis=1)) + eps)
    return jnp.einsum('nlhd,nhdv,nlh->nlhv', Q, KV, Z) * v_length


if __name__ == "__main__":
    N, L, S, H, D = 2, 16, 16, 2, 32
    key = jax.random.PRNGKey(0)
    kq, kk, kv = jax.random.split(key, 3)
    queries = jax.random.normal(kq, (N, L, H, D), jnp.float32)
    keys = jax.random.normal(kk, (N, S, H, D), jnp.float32)
    values = jax.random.normal(kv, (N, S, H, D), jnp.float32)

    q_mask = jnp.arange(L)[None, :] < jnp.array([L, 12])[:, None]    # [N, L] bool
    kv_mask = jnp.arange(S)[None, :] < jnp.array([S, 10])[:, None]   # [N, S] bool

    ref = _reference(queries, keys, values)
    ref_m = _reference(queries, keys, values, q_mask=q_mask, kv_mask=kv_mask)

    # ---- f32 MXU path (tight tolerance; approx reciprocal ~2^-12 rel error) ----
    out32 = linear_attention(queries, keys, values, mxu_dtype=jnp.float32)
    jax.block_until_ready(out32)
    assert out32.shape == (N, L, H, D)
    assert jnp.allclose(out32, ref, atol=2e-3, rtol=2e-3), "mismatch (f32, no mask)"
    out32_m = linear_attention(queries, keys, values, q_mask=q_mask, kv_mask=kv_mask,
                               mxu_dtype=jnp.float32)
    jax.block_until_ready(out32_m)
    assert jnp.allclose(out32_m, ref_m, atol=2e-3, rtol=2e-3), "mismatch (f32, masked)"

    # ---- default bf16-operand path (fast; looser tolerance for bf16 rounding) ----
    out = linear_attention(queries, keys, values)
    jax.block_until_ready(out)
    assert jnp.allclose(out, ref, atol=5e-2, rtol=5e-2), "mismatch (bf16, no mask)"
    out_m = linear_attention(queries, keys, values, q_mask=q_mask, kv_mask=kv_mask)
    jax.block_until_ready(out_m)
    assert jnp.allclose(out_m, ref_m, atol=5e-2, rtol=5e-2), "mismatch (bf16, masked)"

    print("KERNEL_OK")
</pallas_src>

<mosaic_0001>
module attributes {stable_mosaic.version = 11 : i64} {
  func.func @_kv_reduce_nomask(%arg0: i32, %arg1: memref<64x64xf32, #tpu.memory_space<vmem>>, %arg2: memref<1x16x64xf32, #tpu.memory_space<vmem>>, %arg3: memref<1x16x64xf32, #tpu.memory_space<vmem>>, %arg4: memref<1x64x64xf32, #tpu.memory_space<vmem>>, %arg5: memref<1x64x64xf32, #tpu.memory_space<vmem>>) attributes {dimension_semantics = [#tpu.dimension_semantics<parallel>], iteration_bounds = array<i64: 2>, scalar_prefetch = 0 : i64, scratch_operands = 0 : i64, tpu.core_type = #tpu.core_type<tc>, window_params = [{pipeline_mode = #tpu.pipeline_mode<synchronous>, transform_indices = @transform_0, window_bounds = array<i64: 64, 64>}, {transform_indices = @transform_1, window_bounds = array<i64: 1, 16, 64>}, {transform_indices = @transform_2, window_bounds = array<i64: 1, 16, 64>}, {transform_indices = @transform_3, window_bounds = array<i64: 1, 64, 64>}, {transform_indices = @transform_4, window_bounds = array<i64: 1, 64, 64>}]} {
    %c0 = arith.constant 0 : index
    %c0_0 = arith.constant 0 : index
    %c0_1 = arith.constant 0 : index
    %0 = vector.load %arg2[%c0, %c0_0, %c0_1] : memref<1x16x64xf32, #tpu.memory_space<vmem>>, vector<1x16x64xf32>
    %1 = vector.shape_cast %0 : vector<1x16x64xf32> to vector<16x64xf32>
    %cst = arith.constant 0.000000e+00 : f32
    %2 = vector.broadcast %cst : f32 to vector<16x64xf32>
    %3 = arith.cmpf ogt, %1, %2 : vector<16x64xf32>
    %cst_2 = arith.constant 1.000000e+00 : f32
    %4 = vector.broadcast %cst_2 : f32 to vector<16x64xf32>
    %5 = arith.addf %1, %4 : vector<16x64xf32>
    %6 = math.exp %1 : vector<16x64xf32>
    %7 = arith.select %3, %5, %6 : vector<16x64xi1>, vector<16x64xf32>
    %c0_3 = arith.constant 0 : index
    %c0_4 = arith.constant 0 : index
    %c0_5 = arith.constant 0 : index
    %8 = vector.load %arg3[%c0_3, %c0_4, %c0_5] : memref<1x16x64xf32, #tpu.memory_space<vmem>>, vector<1x16x64xf32>
    %9 = vector.shape_cast %8 : vector<1x16x64xf32> to vector<16x64xf32>
    %cst_6 = arith.constant dense<0.000000e+00> : vector<64x64xf32>
    %10 = tpu.matmul %7, %9, %cst_6 {dimension_numbers = #tpu.dot_dimension_numbers<[0], [0], [1], [1], [0, 1, 1, 1], [], []>} : vector<16x64xf32>, vector<16x64xf32>, vector<64x64xf32> -> vector<64x64xf32>
    %cst_7 = arith.constant 1.000000e+00 : f32
    %11 = vector.broadcast %cst_7 : f32 to vector<16x1xf32>
    %cst_8 = arith.constant dense<0.000000e+00> : vector<64x1xf32>
    %12 = tpu.matmul %7, %11, %cst_8 {dimension_numbers = #tpu.dot_dimension_numbers<[0], [0], [1], [1], [0, 1, 1, 1], [], []>} : vector<16x64xf32>, vector<16x1xf32>, vector<64x1xf32> -> vector<64x1xf32>
    %c0_9 = arith.constant 0 : index
    %c0_10 = arith.constant 0 : index
    %13 = vector.load %arg1[%c0_9, %c0_10] : memref<64x64xf32, #tpu.memory_space<vmem>>, vector<64x64xf32>
    %14 = arith.mulf %10, %13 : vector<64x64xf32>
    %c0_11 = arith.constant 0 : index
    %c0_12 = arith.constant 0 : index
    %c0_13 = arith.constant 0 : index
    %15 = vector.load %arg4[%c0_11, %c0_12, %c0_13] : memref<1x64x64xf32, #tpu.memory_space<vmem>>, vector<1x64x64xf32>
    %16 = vector.shape_cast %15 : vector<1x64x64xf32> to vector<64x64xf32>
    %17 = vector.shape_cast %14 : vector<64x64xf32> to vector<1x64x64xf32>
    tpu.vector_store %arg4[%c0_11, %c0_12, %c0_13], %17 {strides = array<i32>} : memref<1x64x64xf32, #tpu.memory_space<vmem>>, vector<1x64x64xf32>,
    %18 = vector.broadcast %12 : vector<64x1xf32> to vector<64x64xf32>
    %19 = arith.mulf %18, %13 : vector<64x64xf32>
    %c0_14 = arith.constant 0 : index
    %c0_15 = arith.constant 0 : index
    %c0_16 = arith.constant 0 : index
    %20 = vector.load %arg5[%c0_14, %c0_15, %c0_16] : memref<1x64x64xf32, #tpu.memory_space<vmem>>, vector<1x64x64xf32>
    %21 = vector.shape_cast %20 : vector<1x64x64xf32> to vector<64x64xf32>
    %22 = vector.shape_cast %19 : vector<64x64xf32> to vector<1x64x64xf32>
    tpu.vector_store %arg5[%c0_14, %c0_15, %c0_16], %22 {strides = array<i32>} : memref<1x64x64xf32, #tpu.memory_space<vmem>>, vector<1x64x64xf32>,
    return
  }
  func.func @transform_0(%arg0: i32) -> (i32, i32) {
    %c0_i32 = arith.constant 0 : i32
    %c0_i32_0 = arith.constant 0 : i32
    %c0_i32_1 = arith.constant 0 : i32
    return %c0_i32, %c0_i32_0 : i32, i32
  }
  func.func @transform_1(%arg0: i32) -> (i32, i32, i32) {
    %c0_i32 = arith.constant 0 : i32
    %c0_i32_0 = arith.constant 0 : i32
    %c0_i32_1 = arith.constant 0 : i32
    return %arg0, %c0_i32, %c0_i32_0 : i32, i32, i32
  }
  func.func @transform_2(%arg0: i32) -> (i32, i32, i32) {
    %c0_i32 = arith.constant 0 : i32
    %c0_i32_0 = arith.constant 0 : i32
    %c0_i32_1 = arith.constant 0 : i32
    return %arg0, %c0_i32, %c0_i32_0 : i32, i32, i32
  }
  func.func @transform_3(%arg0: i32) -> (i32, i32, i32) {
    %c0_i32 = arith.constant 0 : i32
    %c0_i32_0 = arith.constant 0 : i32
    %c0_i32_1 = arith.constant 0 : i32
    return %arg0, %c0_i32, %c0_i32_0 : i32, i32, i32
  }
  func.func @transform_4(%arg0: i32) -> (i32, i32, i32) {
    %c0_i32 = arith.constant 0 : i32
    %c0_i32_0 = arith.constant 0 : i32
    %c0_i32_1 = arith.constant 0 : i32
    return %arg0, %c0_i32, %c0_i32_0 : i32, i32, i32
  }
}

</mosaic_0001>

<bundles_post_ra>
// kernel: tpu_custom_call.1
= control target key start
LH: loop header
LB: loop body
LE: loop exit
PB: predicated region body
PF: predicated region fallthrough
CT: control target
= control target key end

     0   :  { %10 = vsyncpa [#allocation3], 0  ;;  %s1554_s0 = inlined_call_operand.hbm [shape: f32[64,64], index: 0, kind: input, shape index: {}]   ;;  %s1555_s1 = inlined_call_operand.hbm [shape: f32[2,16,64], index: 1, kind: input, shape index: {}]   ;;  %s1556_s2 = inlined_call_operand.hbm [shape: f32[2,16,64], index: 2, kind: input, shape index: {}]   ;;  %s1557_s3 = inlined_call_operand.hbm [shape: f32[2,64,64], index: 3, kind: output, shape index: {0}]   ;;  %s1558_s4 = inlined_call_operand.hbm [shape: f32[2,64,64], index: 4, kind: output, shape index: {1}]  }
   0x1   :  { %11 = vsyncpa [#allocation6], 0 }
   0x2   :  { %13 = vsyncpa [#allocation6 + $0x1], 0 }
   0x3   :  { %14 = vsyncpa [#allocation4], 0 }
   0x4   :  { %16 = vsyncpa [#allocation4 + $0x1], 0 }
   0x5   :  { %17 = vsyncpa [#allocation10], 0 }
   0x6   :  { %19 = vsyncpa [#allocation10 + $0x1], 0  ;;  %s1207_s15 = smov 0   ;;  %s1209_s16 = smov 0  }
   0x7   :  { %s1211_s17 = smov 0   ;;  %s1213_s18 = smov 0  }
   0x8 LB: > { %s1228_s19 = sadd.s32 1, %s1169_s18   ;;  %s53_s20 = sadd.s32 1, %s1165_s17  ;;  %s1169_s18 = sphi %s1213_s18, %s1578_s18   ;;  %s1165_s17 = sphi %s1211_s17, %s1577_s17   ;;  %s1161_s16 = sphi %s1209_s16, %s1576_s16   ;;  %s1157_s15 = sphi %s1207_s15, %s1575_s15  }
   0x9   : > { %s50_s21 = ssub.s32 %s1169_s18, %s1228_s19  ;;  %p60_p0 = scmp.ne.s32.totalorder %s1165_s17, %s1161_s16 }
   0xa   : > { %p51_p1 = scmp.eq.s32.totalorder %s50_s21, 0  ;;  %p61_p2 = scmp.eq.s32.totalorder %s1169_s18, 0 }
   0xb   : > { %p940_p5 = scmp.lt.s32.totalorder %s1169_s18, 2  ;;  %s181_s23 = sand.u32 1, %s1169_s18  }
   0xc   : > { %s1237_s22 = scalar_select %p51_p1, %s1165_s17, %s53_s20  }
   0xd   : > { %p62_p3 = por %p61_p2, %p60_p0  ;;  %s183_s24 = sand.u32 1, %s1165_s17  }
   0xe   : > { %s1246_s25 = sshll.u32 %s183_s24, 4  ;;  %s853_s26 = sshll.u32 %s1169_s18, 8 }
   0xf   : > { %s1254_s29 = scalar_lea.hbm %s1555_s1, %s853_s26  ;;  %s185_s30 = scalar_lea.vmem [#allocation5], %s1246_s25 }
  0x10   : > { %s192_s5 = sshll.u32 %s185_s30, 4  ;;  %p1257_p6 = pnand %p940_p5, %p62_p3  ;;  %s1261_s5 = int_to_ptr.vmem [resolvable:$true] %s192_s5 }
  0x11   : > { %s1263_s7 = scalar_lea.sflag [#allocation6], %s181_s23  ;;  %s989_s8 = scalar_lea.hbm %s1254_s29, 256 }
  0x12   : > { %p990_p7 = scmp.ne.s32.totalorder %s1254_s29, %s989_s8  ;;  %p991_p8 = pneg %p1257_p6 }
  0x13   : > { %s994_s11 = scalar_lea.hbm %s1555_s1, 512  ;;  %p995_p11 = scmp.lt.s32.totalorder %s1254_s29, %s1555_s1 }
  0x14   : > { %p992_p9 = pnand %p991_p8, %p990_p7  ;;  %p996_p12 = scmp.lt.s32.totalorder %s994_s11, %s989_s8 }
  0x16   : > { %p993_p10 = pneg %p992_p9  ;;  %p997_p13 = por %p996_p12, %p995_p11 }
  0x18   : > { %p998_p1 = pnand %p997_p13, %p993_p10 }
  0x1a   : > { %1001 = shalt.err (!%p998_p1)
}
  0x1b   : > { %s1002_s14 = scalar_lea.vmem %s1261_s5, 256  ;;  %s1171_s20 = smov [#allocation5]  }
  0x1c   : > { %p1003_p2 = scmp.ne.s32.totalorder %s1261_s5, %s1002_s14  ;;  %s1007_s21 = sshll.u32 %s1171_s20, 4  ;;  %s1008_s21 = int_to_ptr.vmem [resolvable:$false] %s1007_s21 }
  0x1d   : > { %s1009_s23 = scalar_lea.vmem %s1008_s21, 512  ;;  %p1010_p7 = scmp.lt.s32.totalorder %s1261_s5, %s1008_s21 }
  0x1e   : > { %p1005_p3 = pnand %p1003_p2, %p991_p8  ;;  %p1011_p9 = scmp.lt.s32.totalorder %s1009_s23, %s1002_s14 }
  0x20   : > { %p1006_p5 = pneg %p1005_p3  ;;  %p1012_p4 = por %p1011_p9, %p1010_p7 }
  0x22   : > { %p1013_p11 = pnand %p1012_p4, %p1006_p5 }
  0x24   : > { %1016 = shalt.err (!%p1013_p11)
}
  0x25   : > { %s1172_s24 = smov 128   ;;  %s1173_s27 = smov 8  }
  0x26   : > { %928 = dma.hbm_to_vmem [thread:$0]  (!%p1257_p6), %s1254_s29, 256, %s1261_s5, %s1263_s7, %s1172_s24, %s1172_s24, %s1173_s27  }
  0x27   : > { %s206_s28 = scalar_lea.vmem [#allocation7], %s1246_s25  ;;  %s1295_s8 = sadd.s32 4294967295, %s1169_s18  }
  0x28   : > { %s213_s30 = sshll.u32 %s206_s28, 4  ;;  %s813_s9 = sadd.s32 4294967294, %s1169_s18   ;;  %s1328_s30 = int_to_ptr.vmem [resolvable:$true] %s213_s30 }
  0x29   : > { %p66_p4 = scmp.ne.s32.totalorder %s1161_s16, %s1157_s15  ;;  %p1559_p10 = scmp.eq.s32.totalorder %s1295_s8, 0 }
  0x2a   : > { %p116_p12 = scmp.eq.s32.totalorder %s1295_s8, 1  ;;  %p122_p13 = scmp.eq.s32.totalorder %s813_s9, 1 }
  0x2b   : > { %p1304_p1 = por %p1559_p10, %p66_p4  ;;  %p814_p2 = scmp.ge.s32.totalorder %s1169_s18, 1 }
  0x2c   : > { %p1312_p3 = por %p116_p12, %p60_p0  ;;  %p1316_p5 = por %p122_p13, %p66_p4 }
  0x2d   : > { %s1563_s10 = scalar_select %p1304_p1, 1, 0 }
  0x2e   : > { %s1564_s25 = scalar_select %p1312_p3, 1, 0 }
  0x2f   : > { %s1565_s29 = scalar_select %p1316_p5, 1, 0 }
  0x30   : > { %p155_p7 = scmp.lt.s32.totalorder %s1169_s18, 3  ;;  %s1326_s12 = scalar_lea.hbm %s1556_s2, %s853_s26 }
  0x31   : > { %s1174_s14 = smov [#allocation2]   ;;  %s1017_s21 = scalar_lea.hbm %s1326_s12, 256 }
  0x32   : > { %p1330_p0 = pnand %p814_p2, %p155_p7  ;;  %s1334_s20 = sshll.u32 %s1174_s14, 4  ;;  %s168_s20 = int_to_ptr.vmem [resolvable:$true] %s1334_s20 }
  0x33   : > { %p1018_p11 = scmp.ne.s32.totalorder %s1326_s12, %s1017_s21  ;;  %s1022_s28 = scalar_lea.hbm %s1556_s2, 512 }
  0x34   : > { %p1023_p13 = scmp.lt.s32.totalorder %s1326_s12, %s1556_s2  ;;  %p1024_p2 = scmp.lt.s32.totalorder %s1022_s28, %s1017_s21 }
  0x35   : > { %p1020_p4 = pnand %p1018_p11, %p991_p8 }
  0x36   : > { %p1025_p7 = por %p1024_p2, %p1023_p13 }
  0x37   : > { %p1021_p12 = pneg %p1020_p4 }
  0x39   : > { %p1026_p10 = pnand %p1025_p7, %p1021_p12 }
  0x3b   : > { %1029 = shalt.err (!%p1026_p10)
}
  0x3c   : > { %s1030_s11 = scalar_lea.vmem %s1328_s30, 256  ;;  %s1175_s14 = smov [#allocation7]  }
  0x3d   : > { %p1031_p9 = scmp.ne.s32.totalorder %s1328_s30, %s1030_s11  ;;  %s1035_s26 = sshll.u32 %s1175_s14, 4  ;;  %s1036_s26 = int_to_ptr.vmem [resolvable:$false] %s1035_s26 }
  0x3e   : > { %s1037_s23 = scalar_lea.vmem %s1036_s26, 512  ;;  %p1038_p5 = scmp.lt.s32.totalorder %s1328_s30, %s1036_s26 }
  0x3f   : > { %p1033_p11 = pnand %p1031_p9, %p991_p8  ;;  %p1039_p3 = scmp.lt.s32.totalorder %s1037_s23, %s1030_s11 }
  0x41   : > { %p1034_p4 = pneg %p1033_p11  ;;  %p1040_p1 = por %p1039_p3, %p1038_p5 }
  0x43   : > { %p1041_p13 = pnand %p1040_p1, %p1034_p4 }
  0x45   : > { %1044 = shalt.err (!%p1041_p13)
}
  0x46   : > { %931 = dma.hbm_to_vmem [thread:$0]  (!%p1257_p6), %s1326_s12, 256, %s1328_s30, %s1263_s7, %s1172_s24, %s1172_s24, %s1173_s27  }
  0x47   : > { %p1567_p8 = scmp.eq.s32.totalorder %s1295_s8, 0  ;;  %p1568_p10 = pneg %p1330_p0 }
  0x48   : > { %s1056_s21 = scalar_lea.vmem %s168_s20, 1024  ;;  %p1064_p2 = scmp.lt.s32.totalorder %s168_s20, %s168_s20 }
  0x49   : > { %p922_p9 = pnand %p1568_p10, %p1567_p8  ;;  %p1057_p1 = scmp.ne.s32.totalorder %s168_s20, %s1056_s21 }
  0x4a   : > { %p1065_p7 = scmp.lt.s32.totalorder %s1056_s21, %s1056_s21 }
  0x4b   : > { %p1047_p3 = pneg %p922_p9 }
  0x4c   : > { %p1066_p11 = por %p1065_p7, %p1064_p2 }
  0x4d   : > { %p1059_p5 = pnand %p1057_p1, %p1047_p3 }
  0x4f   : > { %p1060_p12 = pneg %p1059_p5 }
  0x51   : > { %p1067_p4 = pnand %p1066_p11, %p1060_p12 }
  0x53   : > { %1070 = shalt.err (!%p1067_p4)
}
  0x54   : > { %924 = dma.hbm_to_vmem [thread:$0]  (!%p922_p9), %s1554_s0, 1024, %s168_s20, [#allocation3], %s1172_s24, %s1172_s24, %s1173_s27  }
  0x55   : > { %225 = sbr.rel (%p1330_p0) target bundleno = 605 (0x25d), region = 32  ;;  %p1569_p6 = scmp.eq.s32.totalorder (!%p1330_p0), %s1295_s8, 0 }
  0x5a   : > { %1140 = dma.done.wait (%p1569_p6), [#allocation3], 1024   ;;  %p1570_p13 = pmov %p1569_p6 }
  0x5b   : > { %s231_s30 = sand.u32 1, %s1295_s8   ;;  %s1384_s12 = sand.u32 1, %s1161_s16  }
  0x5c   : > { %1142 = vsyncadd (%p1570_p13), [#allocation3], 4294966272  ;;  %s825_s28 = sshll.u32 %s1384_s12, 4  ;;  %s232_s9 = scalar_lea.sflag [#allocation6], %s231_s30 }
  0x5d   : > { %s235_s5 = scalar_lea.vmem [#allocation5], %s825_s28  ;;  %p1571_p8 = scmp.ne.s32.totalorder %s1563_s10, 0 }
  0x5f   : > { %1144 = dma.done.wait (%p1571_p8), %s232_s9, 512  }
  0x60   : > { %1146 = vsyncadd (%p1571_p8), %s232_s9, 4294966784  ;;  %v279_v0 = vld [vmem:[%s235_s5] sm:$0xff]  ;;  %v280_v1 = vld [vmem:[%s235_s5 + $0x8] sm:$0xff]  ;;  %s244_s24 = scalar_lea.vmem [#allocation7], %s825_s28  ;;  %v1176_v7 = vmov 1.0   ;;  %v1177_v13 = vmov 0  }
  0x61   : > { %v285_v2 = vmul.f32 1.442695, %v279_v0  ;;  %v287_v3 = vmul.f32 1.442695, %v280_v1  ;;  %v283_v4 = vadd.f32 1.0, %v279_v0  ;;  %vm281_vm0 = vcmp.gt.f32.partialorder %v279_v0, 0.0  ;;  %893 = vmatprep.subr.mxu1 %v1176_v7  ;;  %983 = vset.pattern.permute.xlu1 %v1177_v13 }
  0x62   : > { %v292_v5 = vld [vmem:[%s244_s24 + $0x8] sm:$0xff]  ;;  %v284_v6 = vadd.f32 1.0, %v280_v1  ;;  %v291_v8 = vld [vmem:[%s244_s24] sm:$0xff]  ;;  %vm282_vm1 = vcmp.gt.f32.partialorder %v280_v1, 0.0  ;;  %894 = vmatpush3.msra.mxu1 %v1176_v7  ;;  %vm325_vm2 = vcmask 130048   ;;  %s827_s27 = sshll.u32 %s1384_s12, 6 }
  0x63   : > { %985 = vpow2.f32 %v285_v2  ;;  %877 = vmatprep.subr.mxu0 %v292_v5  ;;  %895 = vmatprep.subr.mxu1 %v1176_v7  ;;  %v1408_v22 = vld [vmem:[#allocation2 + $0x8] sm:$0xff]  ;;  %vm576_vm3 = vcmask 523264   ;;  %v1410_v25 = vld [vmem:[#allocation2] sm:$0xff]  ;;  %s1415_s10 = scalar_lea.vmem [#allocation8], %s827_s27  ;;  %v1422_v30 = vld [vmem:[#allocation2 + $0x18] sm:$0xff]  ;;  %s855_s13 = sshll.u32 %s1295_s8, 10 }
  0x64   : > { %987 = vpow2.f32 %v287_v3  ;;  %878 = vmatpush3.msra.mxu0 %v292_v5  ;;  %896 = vmatpush3.msra.mxu1 %v1176_v7  ;;  %v1424_v33 = vld [vmem:[#allocation2 + $0x10] sm:$0xff]  ;;  %v1432_v38 = vld [vmem:[#allocation2 + $0x28] sm:$0xff]  ;;  %v1434_v41 = vld [vmem:[#allocation2 + $0x20] sm:$0xff]  ;;  %s660_s20 = sshll.u32 %s1415_s10, 4  ;;  %s1456_s26 = scalar_lea.hbm %s1557_s3, %s855_s13  ;;  %s1458_s20 = int_to_ptr.vmem [resolvable:$true] %s660_s20 }
  0x65   : > { %879 = vmatprep.subr.mxu0 %v291_v8  ;;  %v1442_v46 = vld [vmem:[#allocation2 + $0x38] sm:$0xff]  ;;  %v566_v49 = vld [vmem:[#allocation2 + $0x30] sm:$0xff]  ;;  %s642_s23 = scalar_lea.sflag [#allocation4], %s1384_s12  ;;  %s1071_s21 = scalar_lea.vmem %s1458_s20, 1024 }
  0x66   : > { %880 = vmatpush3.msra.mxu0 %v291_v8  ;;  %p1072_p0 = scmp.ne.s32.totalorder %s1458_s20, %s1071_s21  ;;  %p1572_p10 = scmp.ne.s32.totalorder %s1564_s25, 0 }
  0x67   : > { %s1178_s6 = smov [#allocation8]  }
  0x68   : > { %p1073_p9 = pnand %p1072_p0, %p1572_p10  ;;  %s1075_s7 = sshll.u32 %s1178_s6, 4  ;;  %s1076_s7 = int_to_ptr.vmem [resolvable:$false] %s1075_s7 }
  0x69   : > { %s1077_s30 = scalar_lea.vmem %s1076_s7, 2048  ;;  %p1078_p1 = scmp.lt.s32.totalorder %s1458_s20, %s1076_s7 }
  0x6a   : > { %p1074_p3 = pneg %p1073_p9  ;;  %p1079_p5 = scmp.lt.s32.totalorder %s1077_s30, %s1071_s21 }
  0x6c   : > { %p1080_p12 = por %p1079_p5, %p1078_p1 }
  0x6e   : > { %p1081_p2 = pnand %p1080_p12, %p1074_p3 }
  0x70   : > { %v986_v9 = vpop.eup %985 }
  0x71   : > { %v988_v10 = vpop.eup %987  ;;  %v289_v11 = vsel %vm281_vm0, %v283_v4, %v986_v9 }
  0x72   : > { %293 = vxpose.xlu0.b32.start [1/2] (short) (narrow) %v289_v11, 64  ;;  %v290_v12 = vsel %vm282_vm1, %v284_v6, %v988_v10 }
  0x76   : > { %294 = vxpose.xlu0.b32.end [2/2] (short) (narrow) %v290_v12, 64 }
  0x9f   : > { %984 = vset.pattern.permute.xlu0 %v1177_v13 }
  0xee   : > { %v309_v14 = vpop.trf.xlu0 }
  0xef   : > { %881 = vmatprep.mubr.msk.f32.mxu0 %vm325_vm2, %v309_v14  ;;  %897 = vmatprep.mubr.msk.f32.mxu1 %vm325_vm2, %v309_v14 }
  0xf2   : > { %v310_v15 = vpop.trf.xlu0 }
  0xf3   : > { %882 = vmatmul.mubr.msk.f32.vlgmr.msra.gmra.mxu0 %vm325_vm2, %v310_v15  ;;  %898 = vmatmul.mubr.msk.f32.vlgmr.msra.gmra.mxu1 %vm325_vm2, %v310_v15 }
  0xf6   : > { %v311_v16 = vpop.trf.xlu0 }
  0xf7   : > { %884 = vmatprep.mubr.msk.f32.mxu0 %vm325_vm2, %v311_v16  ;;  %900 = vmatprep.mubr.msk.f32.mxu1 %vm325_vm2, %v311_v16 }
  0xfa   : > { %v312_v17 = vpop.trf.xlu0 }
  0xfb   : > { %885 = vmatmul.mubr.msk.f32.gmra.mxu0 %vm325_vm2, %v312_v17  ;;  %901 = vmatmul.mubr.msk.f32.gmra.mxu1 %vm325_vm2, %v312_v17 }
  0xfe   : > { %v313_v18 = vpop.trf.xlu0 }
  0xff   : > { %887 = vmatprep.mubr.msk.f32.mxu0 %vm325_vm2, %v313_v18  ;;  %903 = vmatprep.mubr.msk.f32.mxu1 %vm325_vm2, %v313_v18 }
 0x102   : > { %v314_v19 = vpop.trf.xlu0 }
 0x103   : > { %888 = vmatmul.mubr.msk.f32.gmra.mxu0 %vm325_vm2, %v314_v19  ;;  %904 = vmatmul.mubr.msk.f32.gmra.mxu1 %vm325_vm2, %v314_v19 }
 0x106   : > { %v315_v20 = vpop.trf.xlu0 }
 0x107   : > { %890 = vmatprep.mubr.msk.f32.mxu0 %vm325_vm2, %v315_v20  ;;  %906 = vmatprep.mubr.msk.f32.mxu1 %vm325_vm2, %v315_v20 }
 0x10a   : > { %v316_v21 = vpop.trf.xlu0 }
 0x10b   : > { %891 = vmatmul.mubr.msk.f32.gmra.mxu0 %vm325_vm2, %v316_v21  ;;  %907 = vmatmul.mubr.msk.f32.gmra.mxu1 %vm325_vm2, %v316_v21 }
 0x1b3   : > { %v883_v23 = vpop.f32.mrf.mxu0  ;;  %v899_v24 = vpop.f32.mrf.mxu1 }
 0x1b4   : > { %v569_v26 = vmul.f32 %v883_v23, %v1408_v22  ;;  %592 = vperm.xlu1 %983, %v899_v24  }
 0x1b5   : > { %v416_v27 = vpop.f32.mrf.mxu0  ;;  %v521_v29 = vpop.f32.mrf.mxu1 }
 0x1b6   : > { %578 = vst.msk [vmem:[%s1415_s10 + $0x8] sm:$0xff] %vm576_vm3, %v569_v26  ;;  %v568_v28 = vmul.f32 %v1410_v25, %v416_v27 }
 0x1b8   : > { %577 = vst.msk [vmem:[%s1415_s10] sm:$0xff] %vm576_vm3, %v568_v28  ;;  %587 = vperm.xlu1 %983, %v521_v29  }
 0x1bb   : > { %v886_v31 = vpop.f32.mrf.mxu0  ;;  %v902_v32 = vpop.f32.mrf.mxu1 }
 0x1bc   : > { %v571_v34 = vmul.f32 %v886_v31, %v1422_v30  ;;  %602 = vperm.xlu1 %983, %v902_v32  }
 0x1bd   : > { %v426_v35 = vpop.f32.mrf.mxu0  ;;  %v531_v36 = vpop.f32.mrf.mxu1 }
 0x1be   : > { %580 = vst.msk [vmem:[%s1415_s10 + $0x18] sm:$0xff] %vm576_vm3, %v571_v34  ;;  %v570_v37 = vmul.f32 %v1424_v33, %v426_v35  ;;  %597 = vperm.xlu0 %984, %v531_v36  }
 0x1c0   : > { %579 = vst.msk [vmem:[%s1415_s10 + $0x10] sm:$0xff] %vm576_vm3, %v570_v37 }
 0x1c3   : > { %v889_v39 = vpop.f32.mrf.mxu0  ;;  %v905_v40 = vpop.f32.mrf.mxu1 }
 0x1c4   : > { %v573_v42 = vmul.f32 %v889_v39, %v1432_v38  ;;  %612 = vperm.xlu1 %983, %v905_v40  }
 0x1c5   : > { %v436_v43 = vpop.f32.mrf.mxu0  ;;  %v541_v45 = vpop.f32.mrf.mxu1 }
 0x1c6   : > { %582 = vst.msk [vmem:[%s1415_s10 + $0x28] sm:$0xff] %vm576_vm3, %v573_v42  ;;  %v572_v44 = vmul.f32 %v1434_v41, %v436_v43 }
 0x1c8   : > { %581 = vst.msk [vmem:[%s1415_s10 + $0x20] sm:$0xff] %vm576_vm3, %v572_v44  ;;  %607 = vperm.xlu1 %983, %v541_v45  }
 0x1cb   : > { %v892_v47 = vpop.f32.mrf.mxu0  ;;  %v908_v48 = vpop.f32.mrf.mxu1 }
 0x1cc   : > { %v575_v50 = vmul.f32 %v892_v47, %v1442_v46 }
 0x1cd   : > { %v446_v51 = vpop.f32.mrf.mxu0  ;;  %v551_v52 = vpop.f32.mrf.mxu1 }
 0x1ce   : > { %584 = vst.msk [vmem:[%s1415_s10 + $0x38] sm:$0xff] %vm576_vm3, %v575_v50  ;;  %v574_v53 = vmul.f32 %v566_v49, %v446_v51  ;;  %617 = vperm.xlu1 %983, %v551_v52  }
 0x1d0   : > { %583 = vst.msk [vmem:[%s1415_s10 + $0x30] sm:$0xff] %vm576_vm3, %v574_v53 }
 0x1d2   : > { %622 = vperm.xlu1 %983, %v908_v48  }
 0x1d3   : > { %1084 = shalt.err (!%p1081_p2)
}
 0x1d4   : > { %s1085_s28 = scalar_lea.hbm %s1456_s26, 1024  ;;  %s1089_s24 = scalar_lea.hbm %s1557_s3, 2048 }
 0x1d5   : > { %p1086_p7 = scmp.ne.s32.totalorder %s1456_s26, %s1085_s28  ;;  %p1090_p6 = scmp.lt.s32.totalorder %s1456_s26, %s1557_s3 }
 0x1d6   : > { %p1091_p13 = scmp.lt.s32.totalorder %s1089_s24, %s1085_s28 }
 0x1d7   : > { %p1087_p11 = pnand %p1086_p7, %p1572_p10 }
 0x1d8   : > { %p1092_p8 = por %p1091_p13, %p1090_p6 }
 0x1d9   : > { %p1088_p4 = pneg %p1087_p11 }
 0x1db   : > { %p1093_p0 = pnand %p1092_p8, %p1088_p4 }
 0x1dd   : > { %1096 = shalt.err (!%p1093_p0)
}
 0x1de   : > { %s1179_s14 = smov 128   ;;  %s1180_s21 = smov 8  }
 0x1df   : > { %917 = dma.vmem_to_hbm [thread:$0]  (%p1572_p10), %s1458_s20, 1024, %s1456_s26, %s642_s23, %s1179_s14, %s1179_s14, %s1180_s21  }
 0x1e0   : > { %s278_s6 = scalar_lea.vmem [#allocation9], %s827_s27  ;;  %s1507_s23 = scalar_lea.hbm %s1558_s4, %s855_s13 }
 0x1e1   : > { %s676_s27 = sshll.u32 %s278_s6, 4  ;;  %s647_s7 = scalar_lea.sflag [#allocation10], %s1384_s12  ;;  %s1509_s27 = int_to_ptr.vmem [resolvable:$true] %s676_s27 }
 0x1e2   : > { %s1097_s30 = scalar_lea.vmem %s1509_s27, 1024  ;;  %s1181_s28 = smov [#allocation9]  }
 0x1e3   : > { %p1098_p9 = scmp.ne.s32.totalorder %s1509_s27, %s1097_s30  ;;  %s1101_s8 = sshll.u32 %s1181_s28, 4  ;;  %s1102_s8 = int_to_ptr.vmem [resolvable:$false] %s1101_s8 }
 0x1e4   : > { %s1103_s9 = scalar_lea.vmem %s1102_s8, 2048  ;;  %p1104_p5 = scmp.lt.s32.totalorder %s1509_s27, %s1102_s8 }
 0x1e5   : > { %p1099_p3 = pnand %p1098_p9, %p1572_p10  ;;  %p1105_p12 = scmp.lt.s32.totalorder %s1103_s9, %s1097_s30 }
 0x1e7   : > { %p1100_p1 = pneg %p1099_p3  ;;  %p1106_p2 = por %p1105_p12, %p1104_p5 }
 0x1e9   : > { %p1107_p7 = pnand %p1106_p2, %p1100_p1 }
 0x22f   : > { %v593_v54 = vpop.permute.xlu1 %592 }
 0x230   : > { %v626_v55 = vmul.f32 %v593_v54, %v1408_v22 }
 0x232   : > { %634 = vst.msk [vmem:[%s278_s6 + $0x8] sm:$0xff] %vm576_vm3, %v626_v55 }
 0x233   : > { %v588_v56 = vpop.permute.xlu1 %587 }
 0x234   : > { %v625_v57 = vmul.f32 %v588_v56, %v1410_v25 }
 0x236   : > { %633 = vst.msk [vmem:[%s278_s6] sm:$0xff] %vm576_vm3, %v625_v57 }
 0x237   : > { %v603_v58 = vpop.permute.xlu1 %602 }
 0x238   : > { %v628_v59 = vmul.f32 %v603_v58, %v1422_v30 }
 0x239   : > { %v598_v60 = vpop.permute.xlu0 %597 }
 0x23a   : > { %636 = vst.msk [vmem:[%s278_s6 + $0x18] sm:$0xff] %vm576_vm3, %v628_v59  ;;  %v627_v61 = vmul.f32 %v598_v60, %v1424_v33 }
 0x23c   : > { %635 = vst.msk [vmem:[%s278_s6 + $0x10] sm:$0xff] %vm576_vm3, %v627_v61 }
 0x23f   : > { %v613_v62 = vpop.permute.xlu1 %612 }
 0x240   : > { %v630_v63 = vmul.f32 %v613_v62, %v1432_v38 }
 0x242   : > { %638 = vst.msk [vmem:[%s278_s6 + $0x28] sm:$0xff] %vm576_vm3, %v630_v63 }
 0x243   : > { %v608_v0 = vpop.permute.xlu1 %607 }
 0x244   : > { %v629_v1 = vmul.f32 %v608_v0, %v1434_v41 }
 0x246   : > { %637 = vst.msk [vmem:[%s278_s6 + $0x20] sm:$0xff] %vm576_vm3, %v629_v1 }
 0x249   : > { %v618_v2 = vpop.permute.xlu1 %617 }
 0x24a   : > { %v631_v3 = vmul.f32 %v618_v2, %v566_v49 }
 0x24c   : > { %639 = vst.msk [vmem:[%s278_s6 + $0x30] sm:$0xff] %vm576_vm3, %v631_v3 }
 0x24d   : > { %v623_v4 = vpop.permute.xlu1 %622 }
 0x24e   : > { %v632_v5 = vmul.f32 %v623_v4, %v1442_v46 }
 0x250   : > { %640 = vst.msk [vmem:[%s278_s6 + $0x38] sm:$0xff] %vm576_vm3, %v632_v5 }
 0x251   : > { %1110 = shalt.err (!%p1107_p7)
}
 0x252   : > { %s1111_s13 = scalar_lea.hbm %s1507_s23, 1024  ;;  %s1115_s24 = scalar_lea.hbm %s1558_s4, 2048 }
 0x253   : > { %p1112_p11 = scmp.ne.s32.totalorder %s1507_s23, %s1111_s13  ;;  %p1116_p13 = scmp.lt.s32.totalorder %s1507_s23, %s1558_s4 }
 0x254   : > { %p1117_p8 = scmp.lt.s32.totalorder %s1115_s24, %s1111_s13 }
 0x255   : > { %p1113_p4 = pnand %p1112_p11, %p1572_p10 }
 0x256   : > { %p1118_p0 = por %p1117_p8, %p1116_p13 }
 0x257   : > { %p1114_p6 = pneg %p1113_p4 }
 0x259   : > { %p1119_p9 = pnand %p1118_p0, %p1114_p6 }
 0x25b   : > { %1122 = shalt.err (!%p1119_p9)
}
 0x25c   : > { %918 = dma.vmem_to_hbm [thread:$0]  (%p1572_p10), %s1509_s27, 1024, %s1507_s23, %s647_s7, %s1179_s14, %s1179_s14, %s1180_s21  }
 0x25d PF: > { %s691_s6 = sand.u32 1, %s1157_s15   ;;  %p1573_p3 = scmp.ne.s32.totalorder %s1565_s29, 0 }
 0x25e   : > { %p1574_p1 = scmp.ge.s32.totalorder %s1169_s18, 2  ;;  %s692_s20 = scalar_lea.sflag [#allocation4], %s691_s6 }
 0x260   : > { %p933_p5 = pnand %p1574_p1, %p1573_p3 }
 0x262   : > { %p934_p12 = pneg %p933_p5 }
 0x264   : > { %1148 = dma.done.wait (%p934_p12), %s692_s20, 1024  }
 0x265   : > { %1150 = vsyncadd (%p934_p12), %s692_s20, 4294966272  ;;  %s701_s26 = scalar_lea.sflag [#allocation10], %s691_s6 }
 0x266   : > { %1152 = dma.done.wait (%p934_p12), %s701_s26, 1024  }
 0x267   : > { %1154 = vsyncadd (%p934_p12), %s701_s26, 4294966272  ;;  %p22_p10 = scmp.ge.s32.totalorder %s1228_s19, 4   ;;  %s1575_s15 = smov %s1161_s16 }
 0x268   : > { %s1576_s16 = smov %s1165_s17  ;;  %s1577_s17 = smov %s1237_s22 }
 0x269   : > { %s1578_s18 = smov %s1228_s19  ;;  %24 = sbr.rel (!%p22_p10) target bundleno = 8 (0x8), region = 110 }
 0x26e   :  { %706 = vsyncpa [#allocation3], 1 }
 0x26f   :  { %708 = vsyncpa [#allocation3 + $0x1], 1 }
 0x270   :  { %709 = vsyncpa [#allocation6], 1 }
 0x271   :  { %711 = vsyncpa [#allocation6 + $0x1], 1 }
 0x272   :  { %712 = vsyncpa [#allocation4], 1 }
 0x273   :  { %714 = vsyncpa [#allocation4 + $0x1], 1 }
 0x274   :  { %715 = vsyncpa [#allocation10], 1 }
 0x275   :  { %717 = vsyncpa [#allocation10 + $0x1], 1 }

</bundles_post_ra>
